<compile_context>
chip_gen: v7x
topology: tpu7x:2x2x1
jax: 0.10.0
libtpu: 0.0.40
codegen_flags: <defaults>
</compile_context>

<pallas_src>
import jax
import jax.numpy as jnp
from jax import lax
from jax.experimental import pallas as pl
from jax.experimental.pallas import tpu as pltpu


def rnn_kernel(x_ref, wih0_ref, wrec_ref, brec_ref, wlin_ref, blin_ref,
               out_ref, h1_hist_ref):
    """Two stacked tanh-RNN layers + linear head (whole sequence per call)."""
    seq_len = x_ref.shape[0]
    hidden = wrec_ref.shape[-1]

    # Packed loop-invariant parameters (loaded once per call).
    whh0 = wrec_ref[0]                                  # (H, H)
    wih1 = wrec_ref[1]                                  # (H, H)
    whh1 = wrec_ref[2]                                  # (H, H)
    b0 = brec_ref[0:1, :]                               # (1, H)  bih0 + bhh0
    b1 = brec_ref[1:2, :]                               # (1, H)  bih1 + bhh1

    # Hoisted layer-0 input projection: one M=T matmul instead of T M=1 matmuls
    # inside the serial recurrence.
    xproj = jnp.dot(x_ref[...], wih0_ref[...],
                    preferred_element_type=jnp.float32) + b0        # (T, H)

    h0 = jnp.zeros((1, hidden), jnp.float32)
    rec1 = jnp.zeros((1, hidden), jnp.float32)          # h1[-1] @ whh1 == 0

    # Serial recurrence, fully unrolled (T is small & compile-time static).
    for t in range(seq_len):
        # Critical path: h0@whh0 -> tanh -> h0@wih1 -> tanh
        h0 = jnp.tanh(xproj[t:t + 1, :]
                      + jnp.dot(h0, whh0, preferred_element_type=jnp.float32))
        h1 = jnp.tanh(jnp.dot(h0, wih1, preferred_element_type=jnp.float32)
                      + rec1 + b1)
        # Per-step row store into VMEM scratch (overlaps next step's compute).
        h1_hist_ref[t:t + 1, :] = h1
        if t + 1 < seq_len:
            # Off the critical path: only consumed at step t+1, so the LLO
            # scheduler can pipeline it under layer-0 of step t+1.
            rec1 = jnp.dot(h1, whh1, preferred_element_type=jnp.float32)

    # Deferred linear head: one batched matmul + one store.
    out = jnp.dot(h1_hist_ref[...], wlin_ref[...],
                  preferred_element_type=jnp.float32) + blin_ref[...]
    out_ref[...] = out.astype(out_ref.dtype)


def rnn_forward(x, packed):
    """x: (seq_len, input_dim) f32 -> (seq_len, output_dim) f32."""
    seq_len = x.shape[0]
    hidden = packed["wrec"].shape[-1]
    output_dim = packed["wlin"].shape[1]
    vmem = pl.BlockSpec(memory_space=pltpu.MemorySpace.VMEM)
    return pl.pallas_call(
        rnn_kernel,
        out_shape=jax.ShapeDtypeStruct((seq_len, output_dim), jnp.float32),
        in_specs=[vmem] * 6,
        out_specs=vmem,
        scratch_shapes=[pltpu.VMEM((seq_len, hidden), jnp.float32)],
    )(x, packed["wih0"], packed["wrec"], packed["brec"],
      packed["wlin"], packed["blin"])


def init_params(key, input_dim, hidden_dim, output_dim):
    """Deterministic init mirroring nn.RNN / nn.Linear shapes.

    Weights are stored pre-transposed so the kernel does x @ W directly.
    """
    ks = jax.random.split(key, 10)
    s = 1.0 / jnp.sqrt(hidden_dim)
    u = lambda k, shape: jax.random.uniform(k, shape, jnp.float32, -s, s)
    return {
        # layer 0: torch W_ih is (hidden, input) -> stored as (input, hidden)
        "wih0": u(ks[0], (input_dim, hidden_dim)),
        "whh0": u(ks[1], (hidden_dim, hidden_dim)),
        "bih0": u(ks[2], (1, hidden_dim)),
        "bhh0": u(ks[3], (1, hidden_dim)),
        # layer 1: input is the layer-0 hidden state
        "wih1": u(ks[4], (hidden_dim, hidden_dim)),
        "whh1": u(ks[5], (hidden_dim, hidden_dim)),
        "bih1": u(ks[6], (1, hidden_dim)),
        "bhh1": u(ks[7], (1, hidden_dim)),
        # linear head: torch W is (output, hidden) -> stored as (hidden, output)
        "wlin": u(ks[8], (hidden_dim, output_dim)),
        "blin": u(ks[9], (1, output_dim)),
    }


def pack_params(p):
    """Host-side one-time pre-fusion: fewer/larger kernel inputs, fused biases."""
    wrec = jnp.stack([p["whh0"], p["wih1"], p["whh1"]], axis=0)      # (3, H, H)
    brec = jnp.concatenate([p["bih0"] + p["bhh0"],
                            p["bih1"] + p["bhh1"]], axis=0)          # (2, H)
    return {
        "wih0": p["wih0"],
        "wrec": wrec,
        "brec": brec,
        "wlin": p["wlin"],
        "blin": p["blin"],
    }


def rnn_forward_ref(x, p):
    """Pure-JAX reference of the PyTorch forward semantics."""
    hidden = p["whh0"].shape[0]

    def step(carry, x_t):
        h0, h1 = carry
        x_t = x_t[None, :]
        h0 = jnp.tanh(x_t @ p["wih0"] + h0 @ p["whh0"] + p["bih0"] + p["bhh0"])
        h1 = jnp.tanh(h0 @ p["wih1"] + h1 @ p["whh1"] + p["bih1"] + p["bhh1"])
        out = h1 @ p["wlin"] + p["blin"]
        return (h0, h1), out[0]

    init = (jnp.zeros((1, hidden), jnp.float32),
            jnp.zeros((1, hidden), jnp.float32))
    _, outs = lax.scan(step, init, x)
    return outs


if __name__ == "__main__":
    # Small shapes consistent with the module: (seq, input_dim) -> (seq, output_dim)
    seq_len, input_dim, hidden_dim, output_dim = 8, 32, 32, 16

    key = jax.random.PRNGKey(0)
    k_x, k_p = jax.random.split(key)
    x = jax.random.normal(k_x, (seq_len, input_dim), jnp.float32)
    params = init_params(k_p, input_dim, hidden_dim, output_dim)
    packed = pack_params(params)

    out = rnn_forward(x, packed)
    out = jax.block_until_ready(out)

    ref = rnn_forward_ref(x, params)
    assert out.shape == (seq_len, output_dim)
    assert jnp.allclose(out, ref, atol=1e-5, rtol=1e-5), "mismatch vs JAX reference"

    print("KERNEL_OK")
</pallas_src>

<mosaic_0001>
module attributes {stable_mosaic.version = 11 : i64} {
  func.func @rnn_kernel(%arg0: memref<8x32xf32, #tpu.memory_space<vmem>>, %arg1: memref<32x32xf32, #tpu.memory_space<vmem>>, %arg2: memref<3x32x32xf32, #tpu.memory_space<vmem>>, %arg3: memref<2x32xf32, #tpu.memory_space<vmem>>, %arg4: memref<32x16xf32, #tpu.memory_space<vmem>>, %arg5: memref<1x16xf32, #tpu.memory_space<vmem>>, %arg6: memref<8x16xf32, #tpu.memory_space<vmem>>, %arg7: memref<8x32xf32, #tpu.memory_space<vmem>>) attributes {dimension_semantics = [], scalar_prefetch = 0 : i64, scratch_operands = 1 : i64, tpu.core_type = #tpu.core_type<tc>} {
    %c0 = arith.constant 0 : index
    %c0_0 = arith.constant 0 : index
    %c0_1 = arith.constant 0 : index
    %0 = vector.load %arg2[%c0, %c0_0, %c0_1] : memref<3x32x32xf32, #tpu.memory_space<vmem>>, vector<1x32x32xf32>
    %1 = vector.shape_cast %0 : vector<1x32x32xf32> to vector<32x32xf32>
    %c1 = arith.constant 1 : index
    %c0_2 = arith.constant 0 : index
    %c0_3 = arith.constant 0 : index
    %2 = vector.load %arg2[%c1, %c0_2, %c0_3] : memref<3x32x32xf32, #tpu.memory_space<vmem>>, vector<1x32x32xf32>
    %3 = vector.shape_cast %2 : vector<1x32x32xf32> to vector<32x32xf32>
    %c2 = arith.constant 2 : index
    %c0_4 = arith.constant 0 : index
    %c0_5 = arith.constant 0 : index
    %4 = vector.load %arg2[%c2, %c0_4, %c0_5] : memref<3x32x32xf32, #tpu.memory_space<vmem>>, vector<1x32x32xf32>
    %5 = vector.shape_cast %4 : vector<1x32x32xf32> to vector<32x32xf32>
    %c0_6 = arith.constant 0 : index
    %c0_7 = arith.constant 0 : index
    %6 = vector.load %arg3[%c0_6, %c0_7] : memref<2x32xf32, #tpu.memory_space<vmem>>, vector<1x32xf32>
    %c1_8 = arith.constant 1 : index
    %c0_9 = arith.constant 0 : index
    %7 = vector.load %arg3[%c1_8, %c0_9] : memref<2x32xf32, #tpu.memory_space<vmem>>, vector<1x32xf32>
    %c0_10 = arith.constant 0 : index
    %c0_11 = arith.constant 0 : index
    %8 = vector.load %arg0[%c0_10, %c0_11] : memref<8x32xf32, #tpu.memory_space<vmem>>, vector<8x32xf32>
    %c0_12 = arith.constant 0 : index
    %c0_13 = arith.constant 0 : index
    %9 = vector.load %arg1[%c0_12, %c0_13] : memref<32x32xf32, #tpu.memory_space<vmem>>, vector<32x32xf32>
    %cst = arith.constant dense<0.000000e+00> : vector<8x32xf32>
    %10 = tpu.matmul %8, %9, %cst {dimension_numbers = #tpu.dot_dimension_numbers<[1], [0], [0], [1], [0, 0, 1, 1], [], []>} : vector<8x32xf32>, vector<32x32xf32>, vector<8x32xf32> -> vector<8x32xf32>
    %11 = vector.broadcast %6 : vector<1x32xf32> to vector<8x32xf32>
    %12 = arith.addf %10, %11 : vector<8x32xf32>
    %cst_14 = arith.constant 0.000000e+00 : f32
    %13 = vector.broadcast %cst_14 : f32 to vector<1x32xf32>
    %cst_15 = arith.constant 0.000000e+00 : f32
    %14 = vector.broadcast %cst_15 : f32 to vector<1x32xf32>
    %15 = vector.extract_strided_slice %12 {offsets = [0, 0], sizes = [1, 32], strides = [1, 1]} : vector<8x32xf32> to vector<1x32xf32>
    %cst_16 = arith.constant dense<0.000000e+00> : vector<1x32xf32>
    %16 = tpu.matmul %13, %1, %cst_16 {dimension_numbers = #tpu.dot_dimension_numbers<[1], [0], [0], [1], [0, 0, 1, 1], [], []>} : vector<1x32xf32>, vector<32x32xf32>, vector<1x32xf32> -> vector<1x32xf32>
    %17 = arith.addf %15, %16 : vector<1x32xf32>
    %18 = math.tanh %17 : vector<1x32xf32>
    %cst_17 = arith.constant dense<0.000000e+00> : vector<1x32xf32>
    %19 = tpu.matmul %18, %3, %cst_17 {dimension_numbers = #tpu.dot_dimension_numbers<[1], [0], [0], [1], [0, 0, 1, 1], [], []>} : vector<1x32xf32>, vector<32x32xf32>, vector<1x32xf32> -> vector<1x32xf32>
    %20 = arith.addf %19, %14 : vector<1x32xf32>
    %21 = arith.addf %20, %7 : vector<1x32xf32>
    %22 = math.tanh %21 : vector<1x32xf32>
    %c0_18 = arith.constant 0 : index
    %c0_19 = arith.constant 0 : index
    %23 = vector.load %arg7[%c0_18, %c0_19] : memref<8x32xf32, #tpu.memory_space<vmem>>, vector<1x32xf32>
    tpu.vector_store %arg7[%c0_18, %c0_19], %22 {strides = array<i32>} : memref<8x32xf32, #tpu.memory_space<vmem>>, vector<1x32xf32>,
    %cst_20 = arith.constant dense<0.000000e+00> : vector<1x32xf32>
    %24 = tpu.matmul %22, %5, %cst_20 {dimension_numbers = #tpu.dot_dimension_numbers<[1], [0], [0], [1], [0, 0, 1, 1], [], []>} : vector<1x32xf32>, vector<32x32xf32>, vector<1x32xf32> -> vector<1x32xf32>
    %25 = vector.extract_strided_slice %12 {offsets = [1, 0], sizes = [1, 32], strides = [1, 1]} : vector<8x32xf32> to vector<1x32xf32>
    %cst_21 = arith.constant dense<0.000000e+00> : vector<1x32xf32>
    %26 = tpu.matmul %18, %1, %cst_21 {dimension_numbers = #tpu.dot_dimension_numbers<[1], [0], [0], [1], [0, 0, 1, 1], [], []>} : vector<1x32xf32>, vector<32x32xf32>, vector<1x32xf32> -> vector<1x32xf32>
    %27 = arith.addf %25, %26 : vector<1x32xf32>
    %28 = math.tanh %27 : vector<1x32xf32>
    %cst_22 = arith.constant dense<0.000000e+00> : vector<1x32xf32>
    %29 = tpu.matmul %28, %3, %cst_22 {dimension_numbers = #tpu.dot_dimension_numbers<[1], [0], [0], [1], [0, 0, 1, 1], [], []>} : vector<1x32xf32>, vector<32x32xf32>, vector<1x32xf32> -> vector<1x32xf32>
    %30 = arith.addf %29, %24 : vector<1x32xf32>
    %31 = arith.addf %30, %7 : vector<1x32xf32>
    %32 = math.tanh %31 : vector<1x32xf32>
    %c1_23 = arith.constant 1 : index
    %c0_24 = arith.constant 0 : index
    %33 = vector.load %arg7[%c1_23, %c0_24] : memref<8x32xf32, #tpu.memory_space<vmem>>, vector<1x32xf32>
    tpu.vector_store %arg7[%c1_23, %c0_24], %32 {strides = array<i32>} : memref<8x32xf32, #tpu.memory_space<vmem>>, vector<1x32xf32>,
    %cst_25 = arith.constant dense<0.000000e+00> : vector<1x32xf32>
    %34 = tpu.matmul %32, %5, %cst_25 {dimension_numbers = #tpu.dot_dimension_numbers<[1], [0], [0], [1], [0, 0, 1, 1], [], []>} : vector<1x32xf32>, vector<32x32xf32>, vector<1x32xf32> -> vector<1x32xf32>
    %35 = vector.extract_strided_slice %12 {offsets = [2, 0], sizes = [1, 32], strides = [1, 1]} : vector<8x32xf32> to vector<1x32xf32>
    %cst_26 = arith.constant dense<0.000000e+00> : vector<1x32xf32>
    %36 = tpu.matmul %28, %1, %cst_26 {dimension_numbers = #tpu.dot_dimension_numbers<[1], [0], [0], [1], [0, 0, 1, 1], [], []>} : vector<1x32xf32>, vector<32x32xf32>, vector<1x32xf32> -> vector<1x32xf32>
    %37 = arith.addf %35, %36 : vector<1x32xf32>
    %38 = math.tanh %37 : vector<1x32xf32>
    %cst_27 = arith.constant dense<0.000000e+00> : vector<1x32xf32>
    %39 = tpu.matmul %38, %3, %cst_27 {dimension_numbers = #tpu.dot_dimension_numbers<[1], [0], [0], [1], [0, 0, 1, 1], [], []>} : vector<1x32xf32>, vector<32x32xf32>, vector<1x32xf32> -> vector<1x32xf32>
    %40 = arith.addf %39, %34 : vector<1x32xf32>
    %41 = arith.addf %40, %7 : vector<1x32xf32>
    %42 = math.tanh %41 : vector<1x32xf32>
    %c2_28 = arith.constant 2 : index
    %c0_29 = arith.constant 0 : index
    %43 = vector.load %arg7[%c2_28, %c0_29] : memref<8x32xf32, #tpu.memory_space<vmem>>, vector<1x32xf32>
    tpu.vector_store %arg7[%c2_28, %c0_29], %42 {strides = array<i32>} : memref<8x32xf32, #tpu.memory_space<vmem>>, vector<1x32xf32>,
    %cst_30 = arith.constant dense<0.000000e+00> : vector<1x32xf32>
    %44 = tpu.matmul %42, %5, %cst_30 {dimension_numbers = #tpu.dot_dimension_numbers<[1], [0], [0], [1], [0, 0, 1, 1], [], []>} : vector<1x32xf32>, vector<32x32xf32>, vector<1x32xf32> -> vector<1x32xf32>
    %45 = vector.extract_strided_slice %12 {offsets = [3, 0], sizes = [1, 32], strides = [1, 1]} : vector<8x32xf32> to vector<1x32xf32>
    %cst_31 = arith.constant dense<0.000000e+00> : vector<1x32xf32>
    %46 = tpu.matmul %38, %1, %cst_31 {dimension_numbers = #tpu.dot_dimension_numbers<[1], [0], [0], [1], [0, 0, 1, 1], [], []>} : vector<1x32xf32>, vector<32x32xf32>, vector<1x32xf32> -> vector<1x32xf32>
    %47 = arith.addf %45, %46 : vector<1x32xf32>
    %48 = math.tanh %47 : vector<1x32xf32>
    %cst_32 = arith.constant dense<0.000000e+00> : vector<1x32xf32>
    %49 = tpu.matmul %48, %3, %cst_32 {dimension_numbers = #tpu.dot_dimension_numbers<[1], [0], [0], [1], [0, 0, 1, 1], [], []>} : vector<1x32xf32>, vector<32x32xf32>, vector<1x32xf32> -> vector<1x32xf32>
    %50 = arith.addf %49, %44 : vector<1x32xf32>
    %51 = arith.addf %50, %7 : vector<1x32xf32>
    %52 = math.tanh %51 : vector<1x32xf32>
    %c3 = arith.constant 3 : index
    %c0_33 = arith.constant 0 : index
    %53 = vector.load %arg7[%c3, %c0_33] : memref<8x32xf32, #tpu.memory_space<vmem>>, vector<1x32xf32>
    tpu.vector_store %arg7[%c3, %c0_33], %52 {strides = array<i32>} : memref<8x32xf32, #tpu.memory_space<vmem>>, vector<1x32xf32>,
    %cst_34 = arith.constant dense<0.000000e+00> : vector<1x32xf32>
    %54 = tpu.matmul %52, %5, %cst_34 {dimension_numbers = #tpu.dot_dimension_numbers<[1], [0], [0], [1], [0, 0, 1, 1], [], []>} : vector<1x32xf32>, vector<32x32xf32>, vector<1x32xf32> -> vector<1x32xf32>
    %55 = vector.extract_strided_slice %12 {offsets = [4, 0], sizes = [1, 32], strides = [1, 1]} : vector<8x32xf32> to vector<1x32xf32>
    %cst_35 = arith.constant dense<0.000000e+00> : vector<1x32xf32>
    %56 = tpu.matmul %48, %1, %cst_35 {dimension_numbers = #tpu.dot_dimension_numbers<[1], [0], [0], [1], [0, 0, 1, 1], [], []>} : vector<1x32xf32>, vector<32x32xf32>, vector<1x32xf32> -> vector<1x32xf32>
    %57 = arith.addf %55, %56 : vector<1x32xf32>
    %58 = math.tanh %57 : vector<1x32xf32>
    %cst_36 = arith.constant dense<0.000000e+00> : vector<1x32xf32>
    %59 = tpu.matmul %58, %3, %cst_36 {dimension_numbers = #tpu.dot_dimension_numbers<[1], [0], [0], [1], [0, 0, 1, 1], [], []>} : vector<1x32xf32>, vector<32x32xf32>, vector<1x32xf32> -> vector<1x32xf32>
    %60 = arith.addf %59, %54 : vector<1x32xf32>
    %61 = arith.addf %60, %7 : vector<1x32xf32>
    %62 = math.tanh %61 : vector<1x32xf32>
    %c4 = arith.constant 4 : index
    %c0_37 = arith.constant 0 : index
    %63 = vector.load %arg7[%c4, %c0_37] : memref<8x32xf32, #tpu.memory_space<vmem>>, vector<1x32xf32>
    tpu.vector_store %arg7[%c4, %c0_37], %62 {strides = array<i32>} : memref<8x32xf32, #tpu.memory_space<vmem>>, vector<1x32xf32>,
    %cst_38 = arith.constant dense<0.000000e+00> : vector<1x32xf32>
    %64 = tpu.matmul %62, %5, %cst_38 {dimension_numbers = #tpu.dot_dimension_numbers<[1], [0], [0], [1], [0, 0, 1, 1], [], []>} : vector<1x32xf32>, vector<32x32xf32>, vector<1x32xf32> -> vector<1x32xf32>
    %65 = vector.extract_strided_slice %12 {offsets = [5, 0], sizes = [1, 32], strides = [1, 1]} : vector<8x32xf32> to vector<1x32xf32>
    %cst_39 = arith.constant dense<0.000000e+00> : vector<1x32xf32>
    %66 = tpu.matmul %58, %1, %cst_39 {dimension_numbers = #tpu.dot_dimension_numbers<[1], [0], [0], [1], [0, 0, 1, 1], [], []>} : vector<1x32xf32>, vector<32x32xf32>, vector<1x32xf32> -> vector<1x32xf32>
    %67 = arith.addf %65, %66 : vector<1x32xf32>
    %68 = math.tanh %67 : vector<1x32xf32>
    %cst_40 = arith.constant dense<0.000000e+00> : vector<1x32xf32>
    %69 = tpu.matmul %68, %3, %cst_40 {dimension_numbers = #tpu.dot_dimension_numbers<[1], [0], [0], [1], [0, 0, 1, 1], [], []>} : vector<1x32xf32>, vector<32x32xf32>, vector<1x32xf32> -> vector<1x32xf32>
    %70 = arith.addf %69, %64 : vector<1x32xf32>
    %71 = arith.addf %70, %7 : vector<1x32xf32>
    %72 = math.tanh %71 : vector<1x32xf32>
    %c5 = arith.constant 5 : index
    %c0_41 = arith.constant 0 : index
    %73 = vector.load %arg7[%c5, %c0_41] : memref<8x32xf32, #tpu.memory_space<vmem>>, vector<1x32xf32>
    tpu.vector_store %arg7[%c5, %c0_41], %72 {strides = array<i32>} : memref<8x32xf32, #tpu.memory_space<vmem>>, vector<1x32xf32>,
    %cst_42 = arith.constant dense<0.000000e+00> : vector<1x32xf32>
    %74 = tpu.matmul %72, %5, %cst_42 {dimension_numbers = #tpu.dot_dimension_numbers<[1], [0], [0], [1], [0, 0, 1, 1], [], []>} : vector<1x32xf32>, vector<32x32xf32>, vector<1x32xf32> -> vector<1x32xf32>
    %75 = vector.extract_strided_slice %12 {offsets = [6, 0], sizes = [1, 32], strides = [1, 1]} : vector<8x32xf32> to vector<1x32xf32>
    %cst_43 = arith.constant dense<0.000000e+00> : vector<1x32xf32>
    %76 = tpu.matmul %68, %1, %cst_43 {dimension_numbers = #tpu.dot_dimension_numbers<[1], [0], [0], [1], [0, 0, 1, 1], [], []>} : vector<1x32xf32>, vector<32x32xf32>, vector<1x32xf32> -> vector<1x32xf32>
    %77 = arith.addf %75, %76 : vector<1x32xf32>
    %78 = math.tanh %77 : vector<1x32xf32>
    %cst_44 = arith.constant dense<0.000000e+00> : vector<1x32xf32>
    %79 = tpu.matmul %78, %3, %cst_44 {dimension_numbers = #tpu.dot_dimension_numbers<[1], [0], [0], [1], [0, 0, 1, 1], [], []>} : vector<1x32xf32>, vector<32x32xf32>, vector<1x32xf32> -> vector<1x32xf32>
    %80 = arith.addf %79, %74 : vector<1x32xf32>
    %81 = arith.addf %80, %7 : vector<1x32xf32>
    %82 = math.tanh %81 : vector<1x32xf32>
    %c6 = arith.constant 6 : index
    %c0_45 = arith.constant 0 : index
    %83 = vector.load %arg7[%c6, %c0_45] : memref<8x32xf32, #tpu.memory_space<vmem>>, vector<1x32xf32>
    tpu.vector_store %arg7[%c6, %c0_45], %82 {strides = array<i32>} : memref<8x32xf32, #tpu.memory_space<vmem>>, vector<1x32xf32>,
    %cst_46 = arith.constant dense<0.000000e+00> : vector<1x32xf32>
    %84 = tpu.matmul %82, %5, %cst_46 {dimension_numbers = #tpu.dot_dimension_numbers<[1], [0], [0], [1], [0, 0, 1, 1], [], []>} : vector<1x32xf32>, vector<32x32xf32>, vector<1x32xf32> -> vector<1x32xf32>
    %85 = vector.extract_strided_slice %12 {offsets = [7, 0], sizes = [1, 32], strides = [1, 1]} : vector<8x32xf32> to vector<1x32xf32>
    %cst_47 = arith.constant dense<0.000000e+00> : vector<1x32xf32>
    %86 = tpu.matmul %78, %1, %cst_47 {dimension_numbers = #tpu.dot_dimension_numbers<[1], [0], [0], [1], [0, 0, 1, 1], [], []>} : vector<1x32xf32>, vector<32x32xf32>, vector<1x32xf32> -> vector<1x32xf32>
    %87 = arith.addf %85, %86 : vector<1x32xf32>
    %88 = math.tanh %87 : vector<1x32xf32>
    %cst_48 = arith.constant dense<0.000000e+00> : vector<1x32xf32>
    %89 = tpu.matmul %88, %3, %cst_48 {dimension_numbers = #tpu.dot_dimension_numbers<[1], [0], [0], [1], [0, 0, 1, 1], [], []>} : vector<1x32xf32>, vector<32x32xf32>, vector<1x32xf32> -> vector<1x32xf32>
    %90 = arith.addf %89, %84 : vector<1x32xf32>
    %91 = arith.addf %90, %7 : vector<1x32xf32>
    %92 = math.tanh %91 : vector<1x32xf32>
    %c7 = arith.constant 7 : index
    %c0_49 = arith.constant 0 : index
    %93 = vector.load %arg7[%c7, %c0_49] : memref<8x32xf32, #tpu.memory_space<vmem>>, vector<1x32xf32>
    tpu.vector_store %arg7[%c7, %c0_49], %92 {strides = array<i32>} : memref<8x32xf32, #tpu.memory_space<vmem>>, vector<1x32xf32>,
    %c0_50 = arith.constant 0 : index
    %c0_51 = arith.constant 0 : index
    %94 = vector.load %arg7[%c0_50, %c0_51] : memref<8x32xf32, #tpu.memory_space<vmem>>, vector<8x32xf32>
    %c0_52 = arith.constant 0 : index
    %c0_53 = arith.constant 0 : index
    %95 = vector.load %arg4[%c0_52, %c0_53] : memref<32x16xf32, #tpu.memory_space<vmem>>, vector<32x16xf32>
    %cst_54 = arith.constant dense<0.000000e+00> : vector<8x16xf32>
    %96 = tpu.matmul %94, %95, %cst_54 {dimension_numbers = #tpu.dot_dimension_numbers<[1], [0], [0], [1], [0, 0, 1, 1], [], []>} : vector<8x32xf32>, vector<32x16xf32>, vector<8x16xf32> -> vector<8x16xf32>
    %c0_55 = arith.constant 0 : index
    %c0_56 = arith.constant 0 : index
    %97 = vector.load %arg5[%c0_55, %c0_56] : memref<1x16xf32, #tpu.memory_space<vmem>>, vector<1x16xf32>
    %98 = vector.broadcast %97 : vector<1x16xf32> to vector<8x16xf32>
    %99 = arith.addf %96, %98 : vector<8x16xf32>
    %c0_57 = arith.constant 0 : index
    %c0_58 = arith.constant 0 : index
    %100 = vector.load %arg6[%c0_57, %c0_58] : memref<8x16xf32, #tpu.memory_space<vmem>>, vector<8x16xf32>
    tpu.vector_store %arg6[%c0_57, %c0_58], %99 {strides = array<i32>} : memref<8x16xf32, #tpu.memory_space<vmem>>, vector<8x16xf32>,
    return
  }
}

</mosaic_0001>

<bundles_post_ra>
// kernel: tpu_custom_call.1
= control target key start
LH: loop header
LB: loop body
LE: loop exit
PB: predicated region body
PF: predicated region fallthrough
CT: control target
= control target key end

     0   :  { %11 = vsyncpa [#allocation4], 0  ;;  %s2941_s0 = inlined_call_operand.vmem [shape: f32[8,32], index: 0, kind: input, shape index: {}]   ;;  %s2942_s1 = inlined_call_operand.vmem [shape: f32[32,32], index: 1, kind: input, shape index: {}]   ;;  %s2943_s2 = inlined_call_operand.hbm [shape: f32[3,32,32], index: 2, kind: input, shape index: {}]   ;;  %s2944_s3 = inlined_call_operand.vmem [shape: f32[2,32], index: 3, kind: input, shape index: {}]   ;;  %s2945_s4 = inlined_call_operand.vmem [shape: f32[32,16], index: 4, kind: input, shape index: {}]   ;;  %s2946_s5 = inlined_call_operand.vmem [shape: f32[1,16], index: 5, kind: input, shape index: {}]   ;;  %s2947_s6 = inlined_call_operand.hbm [shape: f32[8,16], index: 6, kind: output, shape index: {}]  }
   0x1   :  { %12 = vsyncpa [#allocation5], 0  ;;  %s2628_s21 = smov [#allocation3]   ;;  %s2580_s25 = scalar_lea.hbm %s2943_s2, 1536 }
   0x2   :  { %s22_s22 = sshll.u32 %s2628_s21, 4  ;;  %p2581_p0 = scmp.ne.s32.totalorder %s2943_s2, %s2580_s25  ;;  %s23_s22 = int_to_ptr.vmem [resolvable:$true] %s22_s22 }
   0x3   :  { %p2584_p1 = scmp.lt.u32.totalorder %s2580_s25, %s2943_s2 }
   0x5   :  { %p2586_p2 = pnand %p2584_p1, %p2581_p0 }
   0x7   :  { %2589 = shalt.err (!%p2586_p2)
}
   0x8   :  { %s2590_s30 = scalar_lea.vmem %s23_s22, 1536  ;;  %p2595_p4 = scmp.lt.s32.totalorder %s23_s22, %s23_s22 }
   0x9   :  { %p2591_p3 = scmp.ne.s32.totalorder %s23_s22, %s2590_s30  ;;  %p2596_p5 = scmp.lt.s32.totalorder %s2590_s30, %s2590_s30 }
   0xb   :  { %p2597_p6 = por %p2596_p5, %p2595_p4 }
   0xd   :  { %p2598_p7 = pnand %p2597_p6, %p2591_p3 }
   0xf   :  { %2601 = shalt.err (!%p2598_p7)
}
  0x10   :  { %s2629_s7 = smov 128   ;;  %s2630_s8 = smov 8  }
  0x11   :  { %28 = dma.hbm_to_vmem [thread:$0]  %s2943_s2, 1536, %s23_s22, [#allocation4], %s2629_s7, %s2629_s7, %s2630_s8  }
  0x12   :  { %2624 = dma.done.wait [#allocation4], 1536  }
  0x13   :  { %2625 = vsyncadd [#allocation4], 4294965760  ;;  %v2631_v0 = vmov 0.0|0.0   ;;  %vm2632_vm0 = vmmov 0   ;;  %v2633_v1 = vmov 0.0   ;;  %v55_v2 = vld [vmem:[%s2942_s1] sm:$0xff] }
  0x14   :  { %2391 = vmatprep.subr.bf16.mxu0 %v2631_v0  ;;  %2397 = vmatprep.subr.bf16.mxu1 %v2631_v0  ;;  %v56_v3 = vld [vmem:[%s2942_s1 + $0x8] sm:$0xff]  ;;  %v39_v6 = vld [vmem:[#allocation3 + $0x8] sm:$0xff]  ;;  %v58_v8 = vld [vmem:[%s2942_s1 + $0x18] sm:$0xff]  ;;  %vm63_vm1 = vcmask 261120   ;;  %vm286_vm2 = vcmask 253952   ;;  %s2634_s30 = smov [#allocation6]  }
  0x15   :  { %2124 = vmatprep.mubr.msk.f32.mxu0 %vm2632_vm0, %v2633_v1  ;;  %2135 = vmatprep.mubr.msk.f32.mxu1 %vm2632_vm0, %v2633_v1  ;;  %v38_v4 = vld [vmem:[#allocation3] sm:$0xff]  ;;  %v2392_v5 = vpack.c.bf16 %v56_v3, %v55_v2  ;;  %v57_v7 = vld [vmem:[%s2942_s1 + $0x10] sm:$0xff]  ;;  %v40_v10 = vld [vmem:[#allocation3 + $0x10] sm:$0xff]  ;;  %s1956_s7 = sshll.u32 %s2634_s30, 4  ;;  %vm1948_vm3 = vcmask 130048   ;;  %s1957_s7 = int_to_ptr.vmem [resolvable:$true] %s1956_s7 }
  0x16   :  { %v2700_v9 = vpack.c.bf16 %v39_v6, %v38_v4  ;;  %v41_v11 = vld [vmem:[#allocation3 + $0x18] sm:$0xff]  ;;  %v2395_v12 = vpack.c.bf16 %v58_v8, %v57_v7  ;;  %v43_v15 = vld [vmem:[#allocation3 + $0x20] sm:$0xff]  ;;  %v44_v16 = vld [vmem:[#allocation3 + $0x28] sm:$0xff]  ;;  %s2602_s8 = scalar_lea.vmem %s1957_s7, 128  ;;  %p2607_p9 = scmp.lt.s32.totalorder %s1957_s7, %s1957_s7 }
  0x17   :  { %2393 = vmatpush3.bf16.msra.mxu0 %v2392_v5  ;;  %v2704_v13 = vpack.c.bf16 %v41_v11, %v40_v10  ;;  %v54_v14 = vld [vmem:[%s2941_s0] sm:$0xff]  ;;  %v45_v17 = vld [vmem:[#allocation3 + $0x30] sm:$0xff]  ;;  %v2719_v18 = vpack.c.bf16 %v44_v16, %v43_v15  ;;  %v48_v29 = vld [vmem:[#allocation3 + $0x40] sm:$0xff]  ;;  %p2603_p8 = scmp.ne.s32.totalorder %s1957_s7, %s2602_s8  ;;  %p2608_p10 = scmp.lt.s32.totalorder %s2602_s8, %s2602_s8 }
  0x18   :  { %2399 = vmatpush3.bf16.msra.mxu1 %v2700_v9  ;;  %2394 = vmatprep.subr.bf16.mxu0 %v2631_v0  ;;  %v46_v19 = vld [vmem:[#allocation3 + $0x38] sm:$0xff]  ;;  %v49_v30 = vld [vmem:[#allocation3 + $0x48] sm:$0xff]  ;;  %v50_v32 = vld [vmem:[#allocation3 + $0x50] sm:$0xff] }
  0x19   :  { %2400 = vmatprep.subr.bf16.mxu1 %v2631_v0  ;;  %v2722_v20 = vpack.c.bf16 %v46_v19, %v45_v17  ;;  %v1965_v21 = vld [vmem:[%s2944_s3] ss:$0 sm:$0xff]  ;;  %v2743_v31 = vpack.c.bf16 %v49_v30, %v48_v29  ;;  %v2758_v35 = vld [vmem:[%s2944_s3 + $0x1] sm:$0x1]  ;;  %p2609_p11 = por %p2608_p10, %p2607_p9 }
  0x1a   :  { %v51_v33 = vld [vmem:[#allocation3 + $0x58] sm:$0xff] }
  0x1b   :  { %2396 = vmatpush3.bf16.msra.mxu0 %v2395_v12  ;;  %v2749_v34 = vpack.c.bf16 %v51_v33, %v50_v32  ;;  %p2610_p12 = pnand %p2609_p11, %p2603_p8 }
  0x1c   :  { %2402 = vmatpush3.bf16.msra.mxu1 %v2704_v13  ;;  %2403 = vmatprep.subr.bf16.mxu0 %v2631_v0 }
  0x1d   :  { %2409 = vmatprep.subr.bf16.mxu1 %v2631_v0 }
  0x1e   :  { %2125 = vmatmul.mubr.msk.f32.vlgmr.msra.gmra.mrb[0].mxu0 %vm63_vm1, %v54_v14 }
  0x1f   :  { %2136 = vmatmul.mubr.f32.vlgmr.msra.gmra.mrb[0].mxu1 %v2633_v1  ;;  %2146 = vmatprep.mubr.msk.f32.mxu0 %vm2632_vm0, %v2633_v1 }
  0x20   :  { %2157 = vmatprep.mubr.msk.f32.mxu1 %vm2632_vm0, %v2633_v1  ;;  %2405 = vmatpush3.bf16.msra.mxu0 %v2719_v18 }
  0x21   :  { %2406 = vmatprep.subr.bf16.mxu0 %v2631_v0  ;;  %2411 = vmatpush3.bf16.msra.mxu1 %v2743_v31 }
  0x22   :  { %2412 = vmatprep.subr.bf16.mxu1 %v2631_v0 }
  0x24   :  { %2408 = vmatpush3.bf16.msra.mxu0 %v2722_v20 }
  0x25   :  { %2415 = vmatprep.subr.bf16.mxu0 %v2631_v0  ;;  %2414 = vmatpush3.bf16.msra.mxu1 %v2749_v34 }
  0x26   :  { %2421 = vmatprep.subr.bf16.mxu1 %v2631_v0 }
  0xf1   :  { %v133_v22 = vpop.f32.mrb[0].mxu0 }
  0xf2   :  { %v2730_v23 = vadd.f32 %v1965_v21, %v133_v22  ;;  %v2126_v24 = vpop.f32.mrb[1].mxu0  ;;  %v206_v25 = vpop.f32.mrb[0].mxu1 }
  0xf3   :  { %v2137_v26 = vpop.f32.mrb[1].mxu1 }
  0xf4   :  { %v210_v27 = vadd.f32 %v206_v25, %v2730_v23 }
  0xf6   :  { %2548 = vtanh.f32 %v210_v27 }
 0x100   :  { %v2549_v28 = vpop.eup %2548 }
 0x101   :  { %2147 = vmatmul.mubr.msk.f32.vlgmr.msra.gmra.mrb[2].mxu0 %vm63_vm1, %v2549_v28 }
 0x102   :  { %2417 = vmatpush3.bf16.msra.mxu0 %v2700_v9  ;;  %2168 = vmatprep.mubr.msk.f32.mxu0 %vm2632_vm0, %v2633_v1 }
 0x103   :  { %2418 = vmatprep.subr.bf16.mxu0 %v2631_v0 }
 0x106   :  { %2420 = vmatpush3.bf16.msra.mxu0 %v2704_v13 }
 0x107   :  { %2427 = vmatprep.subr.bf16.mxu0 %v2631_v0 }
 0x109   :  { %2169 = vmatmul.mubr.msk.f32.vlgmr.msra.gmra.mrb[4].mxu0 %vm63_vm1, %v2549_v28 }
 0x10a   :  { %2190 = vmatprep.mubr.msk.f32.mxu0 %vm2632_vm0, %v2633_v1  ;;  %2429 = vmatpush3.bf16.msra.mxu0 %v2743_v31 }
 0x10b   :  { %2430 = vmatprep.subr.bf16.mxu0 %v2631_v0 }
 0x10e   :  { %2432 = vmatpush3.bf16.msra.mxu0 %v2749_v34 }
 0x10f   :  { %2439 = vmatprep.subr.bf16.mxu0 %v2631_v0 }
 0x1d4   :  { %v281_v36 = vpop.f32.mrb[2].mxu0 }
 0x1d5   :  { %v282_v37 = vadd.f32 %v281_v36, %v2758_v35  ;;  %v2148_v38 = vpop.f32.mrb[3].mxu0 }
 0x1d7   :  { %2550 = vtanh.f32 %v282_v37 }
 0x1dc   :  { %v427_v39 = vpop.f32.mrb[4].mxu0 }
 0x1dd   :  { %v432_v40 = vrot.slane %v427_v39, 7  ;;  %v2170_v41 = vpop.f32.mrb[5].mxu0 }
 0x1df   :  { %v434_v42 = vadd.f32 %v432_v40, %v2730_v23 }
 0x1e1   :  { %v2551_v43 = vpop.eup %2550  ;;  %2552 = vtanh.f32 %v434_v42 }
 0x1e2   :  { %287 = vst.msk [vmem:[#allocation2] sm:$0x1] %vm286_vm2, %v2551_v43  ;;  %2158 = vmatmul.mubr.msk.f32.vlgmr.msra.gmra.mrb[2].mxu1 %vm63_vm1, %v2551_v43 }
 0x1e3   :  { %2423 = vmatpush3.bf16.msra.mxu1 %v2719_v18  ;;  %2179 = vmatprep.mubr.msk.f32.mxu1 %vm2632_vm0, %v2633_v1 }
 0x1e4   :  { %2424 = vmatprep.subr.bf16.mxu1 %v2631_v0 }
 0x1e7   :  { %2426 = vmatpush3.bf16.msra.mxu1 %v2722_v20 }
 0x1e8   :  { %2433 = vmatprep.subr.bf16.mxu1 %v2631_v0 }
 0x1eb   :  { %v2553_v44 = vpop.eup %2552 }
 0x1ec   :  { %v437_v45 = vrot.slane %v2553_v44, 1 }
 0x1ee   :  { %2180 = vmatmul.mubr.msk.f32.vlgmr.msra.gmra.mrb[4].mxu1 %vm63_vm1, %v437_v45 }
 0x1ef   :  { %2435 = vmatpush3.bf16.msra.mxu1 %v2700_v9  ;;  %2201 = vmatprep.mubr.msk.f32.mxu1 %vm2632_vm0, %v2633_v1 }
 0x1f0   :  { %2436 = vmatprep.subr.bf16.mxu1 %v2631_v0 }
 0x1f3   :  { %2438 = vmatpush3.bf16.msra.mxu1 %v2704_v13 }
 0x1f4   :  { %2445 = vmatprep.subr.bf16.mxu1 %v2631_v0 }
 0x1f6   :  { %2202 = vmatmul.mubr.msk.f32.vlgmr.msra.gmra.mrb[6].mxu1 %vm63_vm1, %v437_v45 }
 0x1f7   :  { %2447 = vmatpush3.bf16.msra.mxu1 %v2743_v31  ;;  %2223 = vmatprep.mubr.msk.f32.mxu1 %vm2632_vm0, %v2633_v1 }
 0x1f8   :  { %2448 = vmatprep.subr.bf16.mxu1 %v2631_v0 }
 0x1fb   :  { %2450 = vmatpush3.bf16.msra.mxu1 %v2749_v34 }
 0x1fc   :  { %2457 = vmatprep.subr.bf16.mxu1 %v2631_v0 }
 0x2b5   :  { %v357_v46 = vpop.f32.mrb[2].mxu1 }
 0x2b6   :  { %v2159_v47 = vpop.f32.mrb[3].mxu1 }
 0x2c1   :  { %v506_v48 = vpop.f32.mrb[4].mxu1 }
 0x2c2   :  { %v507_v49 = vadd.f32 %v506_v48, %v357_v46  ;;  %v2181_v50 = vpop.f32.mrb[5].mxu1 }
 0x2c4   :  { %v510_v51 = vadd.f32 %v507_v49, %v2758_v35 }
 0x2c6   :  { %2554 = vtanh.f32 %v510_v51 }
 0x2c9   :  { %v652_v52 = vpop.f32.mrb[6].mxu1 }
 0x2ca   :  { %v657_v53 = vrot.slane %v652_v52, 6  ;;  %v2203_v54 = vpop.f32.mrb[7].mxu1 }
 0x2cc   :  { %v659_v55 = vadd.f32 %v657_v53, %v2730_v23 }
 0x2ce   :  { %2556 = vtanh.f32 %v659_v55 }
 0x2d0   :  { %v2555_v56 = vpop.eup %2554 }
 0x2d1   :  { %512 = vst.msk [vmem:[#allocation2 + $0x1] sm:$0x1] %vm286_vm2, %v2555_v56  ;;  %2191 = vmatmul.mubr.msk.f32.vlgmr.msra.gmra.mrb[6].mxu0 %vm63_vm1, %v2555_v56 }
 0x2d2   :  { %2441 = vmatpush3.bf16.msra.mxu0 %v2719_v18  ;;  %2212 = vmatprep.mubr.msk.f32.mxu0 %vm2632_vm0, %v2633_v1 }
 0x2d3   :  { %2442 = vmatprep.subr.bf16.mxu0 %v2631_v0 }
 0x2d6   :  { %2444 = vmatpush3.bf16.msra.mxu0 %v2722_v20 }
 0x2d7   :  { %2451 = vmatprep.subr.bf16.mxu0 %v2631_v0 }
 0x2d8   :  { %v2557_v57 = vpop.eup %2556 }
 0x2d9   :  { %v662_v58 = vrot.slane %v2557_v57, 2 }
 0x2db   :  { %2213 = vmatmul.mubr.msk.f32.vlgmr.msra.gmra.mrb[8].mxu0 %vm63_vm1, %v662_v58 }
 0x2dc   :  { %2453 = vmatpush3.bf16.msra.mxu0 %v2700_v9  ;;  %2234 = vmatprep.mubr.msk.f32.mxu0 %vm2632_vm0, %v2633_v1 }
 0x2dd   :  { %2454 = vmatprep.subr.bf16.mxu0 %v2631_v0 }
 0x2e0   :  { %2456 = vmatpush3.bf16.msra.mxu0 %v2704_v13 }
 0x2e1   :  { %2463 = vmatprep.subr.bf16.mxu0 %v2631_v0 }
 0x2e3   :  { %2235 = vmatmul.mubr.msk.f32.vlgmr.msra.gmra.mrb[10].mxu0 %vm63_vm1, %v662_v58 }
 0x2e4   :  { %2465 = vmatpush3.bf16.msra.mxu0 %v2743_v31  ;;  %2256 = vmatprep.mubr.msk.f32.mxu0 %vm2632_vm0, %v2633_v1 }
 0x2e5   :  { %2466 = vmatprep.subr.bf16.mxu0 %v2631_v0 }
 0x2e8   :  { %2468 = vmatpush3.bf16.msra.mxu0 %v2749_v34 }
 0x2e9   :  { %2475 = vmatprep.subr.bf16.mxu0 %v2631_v0 }
 0x3a4   :  { %v582_v59 = vpop.f32.mrb[6].mxu0 }
 0x3a5   :  { %v2192_v60 = vpop.f32.mrb[7].mxu0 }
 0x3ae   :  { %v731_v61 = vpop.f32.mrb[8].mxu0 }
 0x3af   :  { %v732_v62 = vadd.f32 %v731_v61, %v582_v59  ;;  %v2214_v63 = vpop.f32.mrb[9].mxu0 }
 0x3b1   :  { %v735_v2 = vadd.f32 %v732_v62, %v2758_v35 }
 0x3b3   :  { %2558 = vtanh.f32 %v735_v2 }
 0x3b6   :  { %v877_v3 = vpop.f32.mrb[10].mxu0 }
 0x3b7   :  { %v882_v4 = vrot.slane %v877_v3, 5  ;;  %v2236_v5 = vpop.f32.mrb[11].mxu0 }
 0x3b9   :  { %v884_v6 = vadd.f32 %v882_v4, %v2730_v23  ;;  %v1865_v4 = vld [vmem:[%s2945_s4 + $0x8] sm:$0xff] }
 0x3bb   :  { %2560 = vtanh.f32 %v884_v6 }
 0x3bd   :  { %v2559_v7 = vpop.eup %2558 }
 0x3be   :  { %737 = vst.msk [vmem:[#allocation2 + $0x2] sm:$0x1] %vm286_vm2, %v2559_v7  ;;  %2224 = vmatmul.mubr.msk.f32.vlgmr.msra.gmra.mrb[8].mxu1 %vm63_vm1, %v2559_v7 }
 0x3bf   :  { %2459 = vmatpush3.bf16.msra.mxu1 %v2719_v18  ;;  %2245 = vmatprep.mubr.msk.f32.mxu1 %vm2632_vm0, %v2633_v1 }
 0x3c0   :  { %2460 = vmatprep.subr.bf16.mxu1 %v2631_v0 }
 0x3c3   :  { %2462 = vmatpush3.bf16.msra.mxu1 %v2722_v20 }
 0x3c4   :  { %2469 = vmatprep.subr.bf16.mxu1 %v2631_v0 }
 0x3c5   :  { %v2561_v8 = vpop.eup %2560 }
 0x3c6   :  { %v887_v10 = vrot.slane %v2561_v8, 3 }
 0x3c8   :  { %2246 = vmatmul.mubr.msk.f32.vlgmr.msra.gmra.mrb[10].mxu1 %vm63_vm1, %v887_v10 }
 0x3c9   :  { %2471 = vmatpush3.bf16.msra.mxu1 %v2700_v9  ;;  %2267 = vmatprep.mubr.msk.f32.mxu1 %vm2632_vm0, %v2633_v1 }
 0x3ca   :  { %2472 = vmatprep.subr.bf16.mxu1 %v2631_v0 }
 0x3cd   :  { %2474 = vmatpush3.bf16.msra.mxu1 %v2704_v13 }
 0x3ce   :  { %2481 = vmatprep.subr.bf16.mxu1 %v2631_v0 }
 0x3d0   :  { %2268 = vmatmul.mubr.msk.f32.vlgmr.msra.gmra.mrb[12].mxu1 %vm63_vm1, %v887_v10 }
 0x3d1   :  { %2483 = vmatpush3.bf16.msra.mxu1 %v2743_v31  ;;  %2289 = vmatprep.mubr.msk.f32.mxu1 %vm2632_vm0, %v2633_v1 }
 0x3d2   :  { %2484 = vmatprep.subr.bf16.mxu1 %v2631_v0 }
 0x3d5   :  { %2486 = vmatpush3.bf16.msra.mxu1 %v2749_v34 }
 0x3d6   :  { %2493 = vmatprep.subr.bf16.mxu1 %v2631_v0 }
 0x491   :  { %v807_v11 = vpop.f32.mrb[8].mxu1 }
 0x492   :  { %v2225_v12 = vpop.f32.mrb[9].mxu1 }
 0x49b   :  { %v956_v14 = vpop.f32.mrb[10].mxu1 }
 0x49c   :  { %v957_v15 = vadd.f32 %v956_v14, %v807_v11  ;;  %v2247_v16 = vpop.f32.mrb[11].mxu1 }
 0x49d   :  { %v1989_v16 = vld [vmem:[%s2946_s5] ss:$0 sm:$0xff] }
 0x49e   :  { %v960_v17 = vadd.f32 %v957_v15, %v2758_v35 }
 0x4a0   :  { %2562 = vtanh.f32 %v960_v17 }
 0x4a3   :  { %v1102_v19 = vpop.f32.mrb[12].mxu1 }
 0x4a4   :  { %v1107_v21 = vrot.slane %v1102_v19, 4  ;;  %v2269_v22 = vpop.f32.mrb[13].mxu1 }
 0x4a6   :  { %v1109_v24 = vadd.f32 %v1107_v21, %v2730_v23 }
 0x4a8   :  { %2564 = vtanh.f32 %v1109_v24 }
 0x4aa   :  { %v2563_v25 = vpop.eup %2562 }
 0x4ab   :  { %962 = vst.msk [vmem:[#allocation2 + $0x3] sm:$0x1] %vm286_vm2, %v2563_v25  ;;  %2257 = vmatmul.mubr.msk.f32.vlgmr.msra.gmra.mrb[12].mxu0 %vm63_vm1, %v2563_v25 }
 0x4ac   :  { %2477 = vmatpush3.bf16.msra.mxu0 %v2719_v18  ;;  %2278 = vmatprep.mubr.msk.f32.mxu0 %vm2632_vm0, %v2633_v1 }
 0x4ad   :  { %2478 = vmatprep.subr.bf16.mxu0 %v2631_v0 }
 0x4b0   :  { %2480 = vmatpush3.bf16.msra.mxu0 %v2722_v20 }
 0x4b1   :  { %2487 = vmatprep.subr.bf16.mxu0 %v2631_v0 }
 0x4b2   :  { %v2565_v26 = vpop.eup %2564 }
 0x4b3   :  { %v1112_v27 = vrot.slane %v2565_v26, 4 }
 0x4b5   :  { %2279 = vmatmul.mubr.msk.f32.vlgmr.msra.gmra.mrb[14].mxu0 %vm63_vm1, %v1112_v27 }
 0x4b6   :  { %2489 = vmatpush3.bf16.msra.mxu0 %v2700_v9  ;;  %2300 = vmatprep.mubr.msk.f32.mxu0 %vm2632_vm0, %v2633_v1 }
 0x4b7   :  { %2490 = vmatprep.subr.bf16.mxu0 %v2631_v0 }
 0x4ba   :  { %2492 = vmatpush3.bf16.msra.mxu0 %v2704_v13 }
 0x4bb   :  { %2499 = vmatprep.subr.bf16.mxu0 %v2631_v0 }
 0x4bd   :  { %2301 = vmatmul.mubr.msk.f32.vlgmr.msra.gmra.mrb[16].mxu0 %vm63_vm1, %v1112_v27 }
 0x4be   :  { %2501 = vmatpush3.bf16.msra.mxu0 %v2743_v31  ;;  %2322 = vmatprep.mubr.msk.f32.mxu0 %vm2632_vm0, %v2633_v1 }
 0x4bf   :  { %2502 = vmatprep.subr.bf16.mxu0 %v2631_v0 }
 0x4c2   :  { %2504 = vmatpush3.bf16.msra.mxu0 %v2749_v34 }
 0x4c3   :  { %2511 = vmatprep.subr.bf16.mxu0 %v2631_v0 }
 0x57e   :  { %v1032_v28 = vpop.f32.mrb[12].mxu0 }
 0x57f   :  { %v2258_v29 = vpop.f32.mrb[13].mxu0 }
 0x588   :  { %v1181_v30 = vpop.f32.mrb[14].mxu0 }
 0x589   :  { %v1182_v32 = vadd.f32 %v1181_v30, %v1032_v28  ;;  %v2280_v33 = vpop.f32.mrb[15].mxu0 }
 0x58b   :  { %v1185_v36 = vadd.f32 %v1182_v32, %v2758_v35 }
 0x58d   :  { %2566 = vtanh.f32 %v1185_v36 }
 0x590   :  { %v1327_v37 = vpop.f32.mrb[16].mxu0 }
 0x591   :  { %v1332_v38 = vrot.slane %v1327_v37, 3  ;;  %v2302_v39 = vpop.f32.mrb[17].mxu0 }
 0x593   :  { %v1334_v40 = vadd.f32 %v1332_v38, %v2730_v23 }
 0x595   :  { %2568 = vtanh.f32 %v1334_v40 }
 0x597   :  { %v2567_v41 = vpop.eup %2566 }
 0x598   :  { %1187 = vst.msk [vmem:[#allocation2 + $0x4] sm:$0x1] %vm286_vm2, %v2567_v41  ;;  %2290 = vmatmul.mubr.msk.f32.vlgmr.msra.gmra.mrb[14].mxu1 %vm63_vm1, %v2567_v41 }
 0x599   :  { %2495 = vmatpush3.bf16.msra.mxu1 %v2719_v18  ;;  %2311 = vmatprep.mubr.msk.f32.mxu1 %vm2632_vm0, %v2633_v1 }
 0x59a   :  { %2496 = vmatprep.subr.bf16.mxu1 %v2631_v0 }
 0x59d   :  { %2498 = vmatpush3.bf16.msra.mxu1 %v2722_v20 }
 0x59e   :  { %2505 = vmatprep.subr.bf16.mxu1 %v2631_v0 }
 0x59f   :  { %v2569_v42 = vpop.eup %2568 }
 0x5a0   :  { %v1337_v43 = vrot.slane %v2569_v42, 5 }
 0x5a2   :  { %2312 = vmatmul.mubr.msk.f32.vlgmr.msra.gmra.mrb[16].mxu1 %vm63_vm1, %v1337_v43 }
 0x5a3   :  { %2507 = vmatpush3.bf16.msra.mxu1 %v2700_v9  ;;  %2333 = vmatprep.mubr.msk.f32.mxu1 %vm2632_vm0, %v2633_v1 }
 0x5a4   :  { %2508 = vmatprep.subr.bf16.mxu1 %v2631_v0 }
 0x5a7   :  { %2510 = vmatpush3.bf16.msra.mxu1 %v2704_v13 }
 0x5a8   :  { %2517 = vmatprep.subr.bf16.mxu1 %v2631_v0 }
 0x5aa   :  { %2334 = vmatmul.mubr.msk.f32.vlgmr.msra.gmra.mrb[18].mxu1 %vm63_vm1, %v1337_v43 }
 0x5ab   :  { %2519 = vmatpush3.bf16.msra.mxu1 %v2743_v31  ;;  %2355 = vmatprep.mubr.msk.f32.mxu1 %vm2632_vm0, %v2633_v1 }
 0x5ac   :  { %2520 = vmatprep.subr.bf16.mxu1 %v2631_v0 }
 0x5af   :  { %2522 = vmatpush3.bf16.msra.mxu1 %v2749_v34 }
 0x5b0   :  { %2529 = vmatprep.subr.bf16.mxu1 %v2631_v0 }
 0x66b   :  { %v1257_v44 = vpop.f32.mrb[14].mxu1 }
 0x66c   :  { %v2291_v45 = vpop.f32.mrb[15].mxu1 }
 0x675   :  { %v1406_v46 = vpop.f32.mrb[16].mxu1 }
 0x676   :  { %v1407_v47 = vadd.f32 %v1406_v46, %v1257_v44  ;;  %v2313_v48 = vpop.f32.mrb[17].mxu1 }
 0x678   :  { %v1410_v49 = vadd.f32 %v1407_v47, %v2758_v35 }
 0x67a   :  { %2570 = vtanh.f32 %v1410_v49 }
 0x67d   :  { %v1552_v50 = vpop.f32.mrb[18].mxu1 }
 0x67e   :  { %v1557_v51 = vrot.slane %v1552_v50, 2  ;;  %v2335_v31 = vpop.f32.mrb[19].mxu1 }
 0x680   :  { %v1559_v52 = vadd.f32 %v1557_v51, %v2730_v23 }
 0x682   :  { %2572 = vtanh.f32 %v1559_v52 }
 0x684   :  { %v2571_v53 = vpop.eup %2570 }
 0x685   :  { %1412 = vst.msk [vmem:[#allocation2 + $0x5] sm:$0x1] %vm286_vm2, %v2571_v53  ;;  %2323 = vmatmul.mubr.msk.f32.vlgmr.msra.gmra.mrb[18].mxu0 %vm63_vm1, %v2571_v53 }
 0x686   :  { %2513 = vmatpush3.bf16.msra.mxu0 %v2719_v18  ;;  %2344 = vmatprep.mubr.msk.f32.mxu0 %vm2632_vm0, %v2633_v1 }
 0x687   :  { %2514 = vmatprep.subr.bf16.mxu0 %v2631_v0 }
 0x68a   :  { %2516 = vmatpush3.bf16.msra.mxu0 %v2722_v20 }
 0x68b   :  { %2523 = vmatprep.subr.bf16.mxu0 %v2631_v0 }
 0x68c   :  { %v2573_v34 = vpop.eup %2572 }
 0x68d   :  { %v1562_v54 = vrot.slane %v2573_v34, 6 }
 0x68f   :  { %2345 = vmatmul.mubr.msk.f32.vlgmr.msra.gmra.mrb[20].mxu0 %vm63_vm1, %v1562_v54 }
 0x690   :  { %2525 = vmatpush3.bf16.msra.mxu0 %v2700_v9  ;;  %2366 = vmatprep.mubr.msk.f32.mxu0 %vm2632_vm0, %v2633_v1 }
 0x691   :  { %2526 = vmatprep.subr.bf16.mxu0 %v2631_v0 }
 0x694   :  { %2528 = vmatpush3.bf16.msra.mxu0 %v2704_v13 }
 0x695   :  { %2535 = vmatprep.subr.bf16.mxu0 %v2631_v0 }
 0x697   :  { %2367 = vmatmul.mubr.msk.f32.vlgmr.msra.gmra.mrb[22].mxu0 %vm63_vm1, %v1562_v54 }
 0x698   :  { %2388 = vmatprep.mubr.msk.f32.mxu0 %vm2632_vm0, %v2633_v1 }
 0x758   :  { %v1482_v55 = vpop.f32.mrb[18].mxu0 }
 0x759   :  { %v2324_v56 = vpop.f32.mrb[19].mxu0 }
 0x762   :  { %v1631_v57 = vpop.f32.mrb[20].mxu0 }
 0x763   :  { %v1632_v58 = vadd.f32 %v1631_v57, %v1482_v55  ;;  %v2346_v59 = vpop.f32.mrb[21].mxu0 }
 0x765   :  { %v1635_v9 = vadd.f32 %v1632_v58, %v2758_v35 }
 0x767   :  { %2574 = vtanh.f32 %v1635_v9 }
 0x76a   :  { %v1777_v60 = vpop.f32.mrb[22].mxu0 }
 0x76b   :  { %v1782_v61 = vrot.slane %v1777_v60, 1  ;;  %v2368_v62 = vpop.f32.mrb[23].mxu0 }
 0x76d   :  { %v1784_v13 = vadd.f32 %v1782_v61, %v2730_v23  ;;  %v1864_v23 = vld [vmem:[%s2945_s4] sm:$0xff] }
 0x76f   :  { %2576 = vtanh.f32 %v1784_v13 }
 0x771   :  { %v2575_v63 = vpop.eup %2574 }
 0x772   :  { %1637 = vst.msk [vmem:[#allocation2 + $0x6] sm:$0x1] %vm286_vm2, %v2575_v63  ;;  %2356 = vmatmul.mubr.msk.f32.vlgmr.msra.gmra.mrb[20].mxu1 %vm63_vm1, %v2575_v63 }
 0x773   :  { %2531 = vmatpush3.bf16.msra.mxu1 %v2719_v18  ;;  %2377 = vmatprep.mubr.msk.f32.mxu1 %vm2632_vm0, %v2633_v1  ;;  %v2536_v18 = vpack.c.bf16 %v1865_v4, %v1864_v23  ;;  %v1866_v1 = vld [vmem:[%s2945_s4 + $0x10] sm:$0xff] }
 0x774   :  { %2532 = vmatprep.subr.bf16.mxu1 %v2631_v0 }
 0x775   :  { %2537 = vmatpush3.bf16.msra.mxu0 %v2536_v18 }
 0x776   :  { %2538 = vmatprep.subr.bf16.mxu0 %v2631_v0 }
 0x777   :  { %2534 = vmatpush3.bf16.msra.mxu1 %v2722_v20  ;;  %v1867_v20 = vld [vmem:[%s2945_s4 + $0x18] sm:$0xff] }
 0x778   :  { %v2539_v5 = vpack.c.bf16 %v1867_v20, %v1866_v1 }
 0x779   :  { %v2577_v2 = vpop.eup %2576 }
 0x77a   :  { %v1787_v3 = vrot.slane %v2577_v2, 7  ;;  %2540 = vmatpush3.bf16.msra.mxu0 %v2539_v5 }
 0x77c   :  { %2378 = vmatmul.mubr.msk.f32.vlgmr.msra.gmra.mrb[22].mxu1 %vm63_vm1, %v1787_v3 }
 0x845   :  { %v1707_v6 = vpop.f32.mrb[20].mxu1 }
 0x846   :  { %v2357_v7 = vpop.f32.mrb[21].mxu1 }
 0x84f   :  { %v1856_v8 = vpop.f32.mrb[22].mxu1 }
 0x850   :  { %v1857_v10 = vadd.f32 %v1856_v8, %v1707_v6  ;;  %v2379_v11 = vpop.f32.mrb[23].mxu1 }
 0x852   :  { %v1860_v12 = vadd.f32 %v1857_v10, %v2758_v35 }
 0x854   :  { %2578 = vtanh.f32 %v1860_v12 }
 0x85e   :  { %v2579_v14 = vpop.eup %2578 }
 0x85f   :  { %1862 = vst.msk [vmem:[#allocation2 + $0x7] sm:$0x1] %vm286_vm2, %v2579_v14 }
 0x866   :  { %v1863_v15 = vld [vmem:[#allocation2] sm:$0xff] }
 0x867   :  { %2389 = vmatmul.mubr.msk.f32.vlgmr.msra.gmra.mrb[24].mxu0 %vm63_vm1, %v1863_v15 }
 0x93a   :  { %v1944_v0 = vpop.f32.mrb[24].mxu0 }
 0x93b   :  { %v1945_v17 = vadd.f32 %v1989_v16, %v1944_v0  ;;  %v2390_v19 = vpop.f32.mrb[25].mxu0 }
 0x93d   :  { %1949 = vst.msk [vmem:[#allocation6] sm:$0xff] %vm1948_vm3, %v1945_v17 }
 0x93e   :  { %2613 = shalt.err (!%p2610_p12)
}
 0x93f   :  { %s2614_s11 = scalar_lea.hbm %s2947_s6, 128 }
 0x940   :  { %p2615_p13 = scmp.ne.s32.totalorder %s2947_s6, %s2614_s11  ;;  %p2618_p0 = scmp.lt.u32.totalorder %s2614_s11, %s2947_s6 }
 0x942   :  { %p2620_p1 = pnand %p2618_p0, %p2615_p13 }
 0x944   :  { %2623 = shalt.err (!%p2620_p1)
}
 0x945   :  { %1959 = dma.vmem_to_hbm [thread:$0]  %s1957_s7, 128, %s2947_s6, [#allocation5]  }
 0x946   :  { %2626 = dma.done.wait [#allocation5], 128  }
 0x947   :  { %2627 = vsyncadd [#allocation5], 4294967168 }
 0x948   :  { %1963 = vsyncpa [#allocation4], 1 }
 0x949   :  { %1964 = vsyncpa [#allocation5], 1 }

</bundles_post_ra>
